<compile_context>
chip_gen: v6e
topology: v6e:2x2x1
jax: 0.10.0
libtpu: 0.0.40
codegen_flags: <defaults>
</compile_context>

<pallas_src>
import functools

import jax
import jax.numpy as jnp
from jax.experimental import pallas as pl
from jax.experimental.pallas import tpu as pltpu

_EPS = 1e-8  # torch.nn.functional.cosine_similarity default eps


def _combined_loss_kernel(alpha, beta, gamma,
                          y_row_ref, l_row_ref, y_col_ref, l_col_ref, out_ref):
    n = y_row_ref.shape[1]

    y_row = y_row_ref[...]    # (1, N)
    l_row = l_row_ref[...]    # (1, N)
    y_col = y_col_ref[...]    # (N, 1)
    l_col = l_col_ref[...]    # (N, 1)

    # ---- MSE (mean over all N*1 elements) ----------------------------------
    d = y_row - l_row
    mse = jnp.sum(d * d, keepdims=True) * (1.0 / n)                     # (1, 1)

    # ---- cosine-similarity term (dim=1, feature dim of size 1) -------------
    w12 = y_row * l_row
    w1 = y_row * y_row
    w2 = l_row * l_row
    cos = w12 / jnp.maximum(jnp.sqrt(w1 * w2), _EPS)                    # (1, N)
    sim_loss = 1.0 - jnp.sum(cos, keepdims=True) * (1.0 / n)            # (1, 1)

    # ---- pairwise margin-ranking term --------------------------------------
    dy = y_col - y_row                     # (N, N): y_i - y_j
    dl = l_col - l_row                     # (N, N): labels_i - labels_j
    r = jnp.where(dl > 0.0, 1.0, jnp.where(dl < 0.0, -1.0, 0.0))
    hinge = jnp.maximum(-r * dy, 0.0)
    rank = jnp.sum(hinge, keepdims=True) * (1.0 / (n * (n - 1)))        # (1, 1)

    out_ref[...] = alpha * mse + beta * rank + gamma * sim_loss


def combined_loss(y, labels, *, alpha=0.4, beta=0.5, gamma=0.1):
    """y, labels: per-sample scalar predictions/targets, shape (N, 1) or (N,)."""
    y = jnp.asarray(y, jnp.float32).reshape(-1, 1)
    labels = jnp.asarray(labels, jnp.float32).reshape(-1, 1)
    n = y.shape[0]
    if labels.shape[0] != n:
        raise ValueError("y and labels must have the same batch size")
    if n < 2:
        raise ValueError("CombinedLoss pairwise term needs at least 2 samples")

    y_row = y.reshape(1, n)       # free layout change, avoids in-kernel transpose
    l_row = labels.reshape(1, n)

    vmem = pl.BlockSpec(memory_space=pltpu.MemorySpace.VMEM)
    out = pl.pallas_call(
        functools.partial(_combined_loss_kernel,
                          float(alpha), float(beta), float(gamma)),
        out_shape=jax.ShapeDtypeStruct((1, 1), jnp.float32),
        in_specs=[vmem, vmem, vmem, vmem],
        out_specs=vmem,
    )(y_row, l_row, y, labels)
    return out[0, 0]


# ---------------------------------------------------------------------------
# Pure-JAX reference (literal transcription of the PyTorch forward) for a
# correctness check in __main__.
# ---------------------------------------------------------------------------
def _combined_loss_ref(y, labels, alpha, beta, gamma):
    y = jnp.asarray(y, jnp.float32).reshape(-1, 1)
    labels = jnp.asarray(labels, jnp.float32).reshape(-1, 1)
    n = y.shape[0]
    mse = jnp.mean((y - labels) ** 2)
    w12 = jnp.sum(y * labels, axis=1)
    w1 = jnp.sum(y * y, axis=1)
    w2 = jnp.sum(labels * labels, axis=1)
    cos = w12 / jnp.maximum(jnp.sqrt(w1 * w2), _EPS)
    sim = 1.0 - jnp.mean(cos)
    rank = jnp.float32(0.0)
    for i in range(n):
        for j in range(i + 1, n):
            dl = labels[i, 0] - labels[j, 0]
            dy = y[i, 0] - y[j, 0]
            r = jnp.where(dl > 0, 1.0, jnp.where(dl < 0, -1.0, jnp.sign(dy)))
            rank = rank + jnp.maximum(-r * dy, 0.0)
    rank = rank / (n * (n - 1) / 2)
    return alpha * mse + beta * rank + gamma * sim


if __name__ == "__main__":
    key = jax.random.PRNGKey(0)
    ky, kl = jax.random.split(key)
    N = 8
    y = jax.random.normal(ky, (N, 1), jnp.float32)
    # Round targets so some label ties occur (exercises the sign(dL)==0 branch).
    labels = jnp.round(jax.random.normal(kl, (N, 1), jnp.float32) * 2.0) / 2.0

    loss_fn = jax.jit(lambda a, b: combined_loss(a, b, alpha=0.4, beta=0.5, gamma=0.1))
    loss = jax.block_until_ready(loss_fn(y, labels))

    ref = _combined_loss_ref(y, labels, 0.4, 0.5, 0.1)
    assert loss.shape == () and loss.dtype == jnp.float32
    assert bool(jnp.isfinite(loss))
    assert bool(jnp.allclose(loss, ref, rtol=1e-4, atol=1e-5)), (loss, ref)
    print("KERNEL_OK")
</pallas_src>

<mosaic_0001>
module attributes {stable_mosaic.version = 11 : i64} {
  func.func @_combined_loss_kernel(%arg0: memref<1x8xf32, #tpu.memory_space<vmem>>, %arg1: memref<1x8xf32, #tpu.memory_space<vmem>>, %arg2: memref<8x1xf32, #tpu.memory_space<vmem>>, %arg3: memref<8x1xf32, #tpu.memory_space<vmem>>, %arg4: memref<1x1xf32, #tpu.memory_space<vmem>>) attributes {dimension_semantics = [], scalar_prefetch = 0 : i64, scratch_operands = 0 : i64, tpu.core_type = #tpu.core_type<tc>} {
    %c0 = arith.constant 0 : index
    %c0_0 = arith.constant 0 : index
    %0 = vector.load %arg0[%c0, %c0_0] : memref<1x8xf32, #tpu.memory_space<vmem>>, vector<1x8xf32>
    %c0_1 = arith.constant 0 : index
    %c0_2 = arith.constant 0 : index
    %1 = vector.load %arg1[%c0_1, %c0_2] : memref<1x8xf32, #tpu.memory_space<vmem>>, vector<1x8xf32>
    %c0_3 = arith.constant 0 : index
    %c0_4 = arith.constant 0 : index
    %2 = vector.load %arg2[%c0_3, %c0_4] : memref<8x1xf32, #tpu.memory_space<vmem>>, vector<8x1xf32>
    %c0_5 = arith.constant 0 : index
    %c0_6 = arith.constant 0 : index
    %3 = vector.load %arg3[%c0_5, %c0_6] : memref<8x1xf32, #tpu.memory_space<vmem>>, vector<8x1xf32>
    %4 = arith.subf %0, %1 : vector<1x8xf32>
    %5 = arith.mulf %4, %4 : vector<1x8xf32>
    %6 = vector.shape_cast %5 : vector<1x8xf32> to vector<1x1x8xf32>
    %cst = arith.constant dense<0.000000e+00> : vector<1xf32>
    %7 = vector.multi_reduction <add>, %6, %cst [1, 2] : vector<1x1x8xf32> to vector<1xf32>
    %8 = vector.shape_cast %7 : vector<1xf32> to vector<1x1x1xf32>
    %9 = vector.extract %8[0, 0, 0] : f32 from vector<1x1x1xf32>
    %10 = vector.broadcast %9 : f32 to vector<1x1xf32>
    %cst_7 = arith.constant 1.250000e-01 : f32
    %11 = vector.broadcast %cst_7 : f32 to vector<1x1xf32>
    %12 = arith.mulf %10, %11 : vector<1x1xf32>
    %13 = arith.mulf %0, %1 : vector<1x8xf32>
    %14 = arith.mulf %0, %0 : vector<1x8xf32>
    %15 = arith.mulf %1, %1 : vector<1x8xf32>
    %16 = arith.mulf %14, %15 : vector<1x8xf32>
    %17 = math.sqrt %16 : vector<1x8xf32>
    %cst_8 = arith.constant 9.99999993E-9 : f32
    %18 = vector.broadcast %cst_8 : f32 to vector<1x8xf32>
    %19 = arith.maximumf %17, %18 : vector<1x8xf32>
    %20 = arith.divf %13, %19 : vector<1x8xf32>
    %21 = vector.shape_cast %20 : vector<1x8xf32> to vector<1x1x8xf32>
    %cst_9 = arith.constant dense<0.000000e+00> : vector<1xf32>
    %22 = vector.multi_reduction <add>, %21, %cst_9 [1, 2] : vector<1x1x8xf32> to vector<1xf32>
    %23 = vector.shape_cast %22 : vector<1xf32> to vector<1x1x1xf32>
    %24 = vector.extract %23[0, 0, 0] : f32 from vector<1x1x1xf32>
    %25 = vector.broadcast %24 : f32 to vector<1x1xf32>
    %cst_10 = arith.constant 1.250000e-01 : f32
    %26 = vector.broadcast %cst_10 : f32 to vector<1x1xf32>
    %27 = arith.mulf %25, %26 : vector<1x1xf32>
    %cst_11 = arith.constant 1.000000e+00 : f32
    %28 = vector.broadcast %cst_11 : f32 to vector<1x1xf32>
    %29 = arith.subf %28, %27 : vector<1x1xf32>
    %30 = vector.broadcast %2 : vector<8x1xf32> to vector<8x8xf32>
    %31 = vector.broadcast %0 : vector<1x8xf32> to vector<8x8xf32>
    %32 = arith.subf %30, %31 : vector<8x8xf32>
    %33 = vector.broadcast %3 : vector<8x1xf32> to vector<8x8xf32>
    %34 = vector.broadcast %1 : vector<1x8xf32> to vector<8x8xf32>
    %35 = arith.subf %33, %34 : vector<8x8xf32>
    %cst_12 = arith.constant 0.000000e+00 : f32
    %36 = vector.broadcast %cst_12 : f32 to vector<8x8xf32>
    %37 = arith.cmpf ogt, %35, %36 : vector<8x8xf32>
    %cst_13 = arith.constant 0.000000e+00 : f32
    %38 = vector.broadcast %cst_13 : f32 to vector<8x8xf32>
    %39 = arith.cmpf olt, %35, %38 : vector<8x8xf32>
    %cst_14 = arith.constant -1.000000e+00 : f32
    %cst_15 = arith.constant 0.000000e+00 : f32
    %40 = vector.broadcast %cst_14 : f32 to vector<8x8xf32>
    %41 = vector.broadcast %cst_15 : f32 to vector<8x8xf32>
    %42 = arith.select %39, %40, %41 : vector<8x8xi1>, vector<8x8xf32>
    %cst_16 = arith.constant 1.000000e+00 : f32
    %43 = vector.broadcast %cst_16 : f32 to vector<8x8xf32>
    %44 = arith.select %37, %43, %42 : vector<8x8xi1>, vector<8x8xf32>
    %cst_17 = arith.constant 0.000000e+00 : f32
    %45 = vector.broadcast %cst_17 : f32 to vector<8x8xf32>
    %46 = arith.subf %45, %44 : vector<8x8xf32>
    %47 = arith.mulf %46, %32 : vector<8x8xf32>
    %cst_18 = arith.constant 0.000000e+00 : f32
    %48 = vector.broadcast %cst_18 : f32 to vector<8x8xf32>
    %49 = arith.maximumf %47, %48 : vector<8x8xf32>
    %50 = vector.shape_cast %49 : vector<8x8xf32> to vector<1x8x8xf32>
    %cst_19 = arith.constant dense<0.000000e+00> : vector<1xf32>
    %51 = vector.multi_reduction <add>, %50, %cst_19 [1, 2] : vector<1x8x8xf32> to vector<1xf32>
    %52 = vector.shape_cast %51 : vector<1xf32> to vector<1x1x1xf32>
    %53 = vector.extract %52[0, 0, 0] : f32 from vector<1x1x1xf32>
    %54 = vector.broadcast %53 : f32 to vector<1x1xf32>
    %cst_20 = arith.constant 0.0178571437 : f32
    %55 = vector.broadcast %cst_20 : f32 to vector<1x1xf32>
    %56 = arith.mulf %54, %55 : vector<1x1xf32>
    %cst_21 = arith.constant 4.000000e-01 : f32
    %57 = vector.broadcast %cst_21 : f32 to vector<1x1xf32>
    %58 = arith.mulf %57, %12 : vector<1x1xf32>
    %cst_22 = arith.constant 5.000000e-01 : f32
    %59 = vector.broadcast %cst_22 : f32 to vector<1x1xf32>
    %60 = arith.mulf %59, %56 : vector<1x1xf32>
    %61 = arith.addf %58, %60 : vector<1x1xf32>
    %cst_23 = arith.constant 1.000000e-01 : f32
    %62 = vector.broadcast %cst_23 : f32 to vector<1x1xf32>
    %63 = arith.mulf %62, %29 : vector<1x1xf32>
    %64 = arith.addf %61, %63 : vector<1x1xf32>
    %c0_24 = arith.constant 0 : index
    %c0_25 = arith.constant 0 : index
    %65 = vector.load %arg4[%c0_24, %c0_25] : memref<1x1xf32, #tpu.memory_space<vmem>>, vector<1x1xf32>
    tpu.vector_store %arg4[%c0_24, %c0_25], %64 {strides = array<i32>} : memref<1x1xf32, #tpu.memory_space<vmem>>, vector<1x1xf32>,
    return
  }
}

</mosaic_0001>

<bundles_post_ra>
// kernel: _lambda_.1
= control target key start
LH: loop header
LB: loop body
LE: loop exit
PB: predicated region body
PF: predicated region fallthrough
CT: control target
= control target key end

     0   :  { %v165_v2 = vmov 0   ;;  %s210_s0 = inlined_call_operand.vmem [shape: f32[1,8], index: 0, kind: input, shape index: {}]   ;;  %s211_s1 = inlined_call_operand.vmem [shape: f32[1,8], index: 1, kind: input, shape index: {}]   ;;  %s212_s2 = inlined_call_operand.vmem [shape: f32[8,1], index: 2, kind: input, shape index: {}]   ;;  %s213_s3 = inlined_call_operand.vmem [shape: f32[8,1], index: 3, kind: input, shape index: {}]   ;;  %s214_s4 = inlined_call_operand.hbm [shape: f32[1,1], index: 4, kind: output, shape index: {}]  }
   0x1   :  { %v21_v0 = vld [vmem:[%s213_s3] sm:$0xff]  ;;  %138 = vset.pattern.permute.xlu0 %v165_v2 }
   0x2   :  { %v19_v1 = vld [vmem:[%s211_s1] sm:$0x1] }
   0x3   :  { %v39_v3 = vmul.f32 %v19_v1, %v19_v1  ;;  %v18_v4 = vld [vmem:[%s210_s0] sm:$0x1] }
   0x4   :  { %9 = vsyncpa [#allocation3], 0  ;;  %78 = vperm.xlu0 %138, %v21_v0   ;;  %v22_v5 = vsub.f32 %v18_v4, %v19_v1  ;;  %v38_v6 = vmul.f32 %v18_v4, %v18_v4  ;;  %v20_v7 = vld [vmem:[%s212_s2] sm:$0xff]  ;;  %vm24_vm0 = vcmask 57344   ;;  %v37_v17 = vmul.f32 %v19_v1, %v18_v4  ;;  %s167_s3 = smov [#allocation2]  }
   0x5   :  { %v70_v21 = vlaneseq  ;;  %v166_v28 = vmov 0.0   ;;  %vm95_vm5 = vcmask 64512   ;;  %s121_s23 = sshll.u32 %s167_s3, 4  ;;  %vm113_vm6 = vcmask 0   ;;  %s122_s23 = int_to_ptr.vmem [resolvable:$true] %s121_s23 }
   0x6   :  { %v23_v8 = vmul.f32 %v22_v5, %v22_v5  ;;  %v40_v9 = vmul.f32 %v39_v3, %v38_v6  ;;  %s143_s24 = scalar_lea.vmem %s122_s23, 16  ;;  %s147_s25 = scalar_lea.vmem %s122_s23, 32 }
   0x7   :  { %v71_v22 = vshrl.u32 %v70_v21, 7  ;;  %p144_p0 = scmp.ne.s32.totalorder %s122_s23, %s143_s24  ;;  %p148_p1 = scmp.lt.s32.totalorder %s122_s23, %s122_s23 }
   0x8   :  { %66 = vperm.xlu0 %138, %v20_v7   ;;  %v25_v10 = vsel %vm24_vm0, %v23_v8, 0.0  ;;  %139 = vrsqrt.f32 %v40_v9  ;;  %vm43_vm1 = vcmp.eq.f32.partialorder %v40_v9, inf  ;;  %v46_v12 = vand.u32 2147483648, %v40_v9  ;;  %p149_p2 = scmp.lt.s32.totalorder %s147_s25, %s143_s24 }
   0x9   :  { %26 = vadd.xlane.f32.xlu1 %v25_v10  ;;  %vm45_vm2 = vcmp.eq.f32.partialorder %v40_v9, 0.0  ;;  %v72_v23 = vsub.s32 0, %v71_v22 }
   0xa   :  { %p150_p3 = por %p149_p2, %p148_p1 }
   0xb   :  { %v85_v24 = vrot.slane %v19_v1, %v72_v23  ;;  %v73_v27 = vrot.slane %v18_v4, %v72_v23 }
   0xc   :  { %p151_p4 = pnand %p150_p3, %p144_p0 }
  0x15   :  { %v140_v11 = vpop.eup %139 }
  0x16   :  { %v42_v13 = vmul.f32 %v140_v11, %v40_v9 }
  0x18   :  { %v44_v14 = vsel %vm43_vm1, %v40_v9, %v42_v13 }
  0x19   :  { %v47_v15 = vsel %vm45_vm2, %v46_v12, %v44_v14 }
  0x1a   :  { %v48_v16 = vmax.f32 %v47_v15, 1e-08 }
  0x1c   :  { %141 = vrcp.f32 %v48_v16 }
  0x29   :  { %v142_v18 = vpop.eup %141 }
  0x2a   :  { %v50_v19 = vmul.f32 %v142_v18, %v37_v17 }
  0x2c   :  { %v51_v20 = vsel %vm24_vm0, %v50_v19, 0.0 }
  0x2d   :  { %52 = vadd.xlane.f32.xlu1 %v51_v20 }
  0x7f   :  { %v79_v25 = vpop.permute.xlu0 %78 }
  0x80   :  { %v87_v26 = vsub.f32 %v79_v25, %v85_v24 }
  0x82   :  { %vm88_vm3 = vcmp.gt.f32.partialorder %v87_v26, 0.0  ;;  %vm89_vm4 = vcmp.lt.f32.partialorder %v87_v26, 0.0 }
  0x83   :  { %v90_v29 = vsel %vm89_vm4, -1.0, %v166_v28  ;;  %v67_v30 = vpop.permute.xlu0 %66 }
  0x84   :  { %v91_v31 = vsel %vm88_vm3, 1.0, %v90_v29  ;;  %v75_v32 = vsub.f32 %v67_v30, %v73_v27 }
  0x85   :  { %v92_v33 = vsub.f32 0.0, %v91_v31 }
  0x87   :  { %v93_v34 = vmul.f32 %v92_v33, %v75_v32 }
  0x89   :  { %v94_v35 = vmax.f32 %v93_v34, 0.0 }
  0x8b   :  { %v96_v36 = vsel %vm95_vm5, %v94_v35, 0.0 }
  0x8c   :  { %97 = vadd.xlane.f32.xlu0 %v96_v36 }
  0x92   :  { %v27_v37 = vpop.xlane.xlu1 %26 }
  0x93   :  { %v28_v38 = vrot.slane %v27_v37, 4 }
  0x95   :  { %v29_v39 = vadd.f32 %v28_v38, %v27_v37 }
  0x97   :  { %v30_v40 = vrot.slane %v29_v39, 2 }
  0x99   :  { %v31_v41 = vadd.f32 %v30_v40, %v29_v39 }
  0x9b   :  { %v32_v42 = vrot.slane %v31_v41, 1 }
  0x9d   :  { %v33_v43 = vadd.f32 %v32_v42, %v31_v41 }
  0x9f   :  { %129 = vpush %v33_v43 }
  0xb6   :  { %v53_v44 = vpop.xlane.xlu1 %52 }
  0xb7   :  { %v54_v45 = vrot.slane %v53_v44, 4 }
  0xb9   :  { %v55_v46 = vadd.f32 %v54_v45, %v53_v44 }
  0xbb   :  { %v56_v47 = vrot.slane %v55_v46, 2 }
  0xbd   :  { %v57_v48 = vadd.f32 %v56_v47, %v55_v46 }
  0xbf   :  { %v58_v49 = vrot.slane %v57_v48, 1 }
  0xc1   :  { %v59_v50 = vadd.f32 %v58_v49, %v57_v48 }
  0xc3   :  { %131 = vpush %v59_v50 }
  0xd0   :  { %s130_s0 = spop %129 }
  0xd1   :  { %v35_v59 = vstv %s130_s0 }
  0xd2   :  { %v36_v61 = vmul.f32 0.125, %v35_v59 }
  0xd4   :  { %v108_v1 = vmul.f32 0.4, %v36_v61 }
  0xf4   :  { %s132_s1 = spop %131 }
  0xf5   :  { %v61_v58 = vstv %s132_s1 }
  0xf6   :  { %v62_v60 = vmul.f32 0.125, %v61_v58 }
  0xf8   :  { %v63_v63 = vsub.f32 1.0, %v62_v60 }
  0xfa   :  { %v111_v3 = vmul.f32 0.1, %v63_v63 }
 0x115   :  { %v98_v51 = vpop.xlane.xlu0 %97 }
 0x116   :  { %v99_v52 = vrot.slane %v98_v51, 4 }
 0x118   :  { %v100_v53 = vadd.f32 %v99_v52, %v98_v51 }
 0x11a   :  { %v101_v54 = vrot.slane %v100_v53, 2 }
 0x11c   :  { %v102_v55 = vadd.f32 %v101_v54, %v100_v53 }
 0x11e   :  { %v103_v56 = vrot.slane %v102_v55, 1 }
 0x120   :  { %v104_v57 = vadd.f32 %v103_v56, %v102_v55 }
 0x122   :  { %133 = vpush %v104_v57 }
 0x153   :  { %s134_s2 = spop %133 }
 0x154   :  { %v106_v62 = vstv %s134_s2 }
 0x155   :  { %v107_v0 = vmul.f32 0.017857144, %v106_v62 }
 0x157   :  { %v109_v2 = vmul.f32 0.5, %v107_v0 }
 0x159   :  { %v110_v4 = vadd.f32 %v109_v2, %v108_v1 }
 0x15b   :  { %v112_v5 = vadd.f32 %v111_v3, %v110_v4 }
 0x15d   :  { %114 = vst.msk [vmem:[#allocation2] sm:$0x1] %vm113_vm6, %v112_v5 }
 0x15e   :  { %154 = shalt.err (!%p151_p4)
}
 0x15f   :  { %124 = dma.vmem_to_hbm [thread:$0]  %s122_s23, 16, %s214_s4, [#allocation3]  }
 0x160   :  { %163 = dma.done.wait [#allocation3], 16  }
 0x161   :  { %164 = vsyncadd [#allocation3], 4294967280 }
 0x162   :  { %128 = vsyncpa [#allocation3], 1 }

</bundles_post_ra>
